<compile_context>
chip_gen: v7x
topology: tpu7x:2x2x1
jax: 0.10.0
libtpu: 0.0.40
codegen_flags: <defaults>
</compile_context>

<pallas_src>
import math
import functools

import jax
import jax.numpy as jnp
import numpy as np
from jax.experimental import pallas as pl
from jax.experimental.pallas import tpu as pltpu


def _gst_layer_kernel(x_ref, wqkv_ref, wo_ref, w1_ref, w2_ref, vecs_ref,
                      o_ref, ctx_ref, *, num_heads: int, eps: float = 1e-5):
    x = x_ref[0]                               # (S, H) f32
    S, H = x.shape
    hd = H // num_heads

    # ---- packed bias / LayerNorm slab: rows are zero-padded to width 4H.
    vecs = vecs_ref[...]                       # (8, 4H) f32
    b_qkv = vecs[0:1, :3 * H]                  # (1, 3H)   (q-part pre-scaled)
    b_o   = vecs[1:2, :H]                      # (1, H)
    b_1   = vecs[2:3, :4 * H]                  # (1, 4H)
    b_2   = vecs[3:4, :H]                      # (1, H)
    g_1   = vecs[4:5, :H]
    be_1  = vecs[5:6, :H]
    g_2   = vecs[6:7, :H]
    be_2  = vecs[7:8, :H]

    # ---- in-projection: qkv = x @ W_in (pre-transposed, q-part pre-scaled)
    qkv = jnp.dot(x.astype(jnp.bfloat16), wqkv_ref[...],
                  preferred_element_type=jnp.float32) + b_qkv      # (S, 3H) f32
    qkv_bf = qkv.astype(jnp.bfloat16)                              # single cast
    q = qkv_bf[:, 0 * H:1 * H]
    k = qkv_bf[:, 1 * H:2 * H]
    v = qkv_bf[:, 2 * H:3 * H]

    # ---- per-head scaled dot-product attention (scale already folded into q);
    #      contexts written directly into a bf16 VMEM scratch slab.
    for h in range(num_heads):
        sl = slice(h * hd, (h + 1) * hd)
        s = jnp.einsum('qd,kd->qk', q[:, sl], k[:, sl],
                       preferred_element_type=jnp.float32)         # (S, S) f32
        s = s - jnp.max(s, axis=-1, keepdims=True)
        p = jnp.exp(s)
        p = p * pl.reciprocal(jnp.sum(p, axis=-1, keepdims=True), approx=True)
        ctx_ref[:, sl] = jnp.dot(p.astype(jnp.bfloat16), v[:, sl],
                                 preferred_element_type=jnp.float32
                                 ).astype(jnp.bfloat16)

    # ---- out projection (weight pre-transposed to (H, H)); ctx already bf16.
    attn_out = jnp.dot(ctx_ref[...], wo_ref[...],
                       preferred_element_type=jnp.float32) + b_o   # (S, H) f32

    def layer_norm(y, g, b):
        mu = jnp.mean(y, axis=-1, keepdims=True)
        d = y - mu
        var = jnp.mean(d * d, axis=-1, keepdims=True)
        return d * jax.lax.rsqrt(var + eps) * g + b

    # ---- residual + layer_norm1 (f32)
    h1 = layer_norm(x + attn_out, g_1, be_1)                       # (S, H)

    # ---- feed forward: H -> 4H (ReLU) -> H (weights pre-transposed)
    ff = jnp.dot(h1.astype(jnp.bfloat16), w1_ref[...],
                 preferred_element_type=jnp.float32) + b_1         # (S, 4H)
    ff = jnp.maximum(ff, 0.0)
    ff = jnp.dot(ff.astype(jnp.bfloat16), w2_ref[...],
                 preferred_element_type=jnp.float32) + b_2         # (S, H)

    # ---- residual + layer_norm2
    o_ref[0] = layer_norm(h1 + ff, g_2, be_2)


def gst_layer_pallas(hidden_states_sbh, params, num_heads, eps=1e-5):
    """hidden_states_sbh: (S, B, H) float32 — PyTorch MHA seq-first layout."""
    S, B, H = hidden_states_sbh.shape
    assert H % num_heads == 0, "hidden_size must be divisible by num_heads"
    x = jnp.transpose(hidden_states_sbh, (1, 0, 2))      # (B, S, H)

    (wqkv, bqkv, wo, bo, w1, b1, w2, b2, g1, be1, g2, be2) = params

    # Fold the 1/sqrt(head_dim) attention scale into the Q rows of the
    # in-projection (one-time, f32, host-side) -> no per-head scale in kernel.
    scale = 1.0 / math.sqrt(H // num_heads)
    wqkv_s = wqkv.at[:H, :].multiply(scale)
    bqkv_s = bqkv.at[:H].multiply(scale)

    # Pre-transpose + bf16-cast all weight matrices (one-time host-side cost).
    wdt = jnp.bfloat16
    wqkv_t = wqkv_s.T.astype(wdt)        # (H, 3H)
    wo_t   = wo.T.astype(wdt)            # (H, H)
    w1_t   = w1.T.astype(wdt)            # (H, 4H)
    w2_t   = w2.T.astype(wdt)            # (4H, H)

    # Pack biases + LayerNorm params into one (8, 4H) f32 slab (single operand).
    F = 4 * H
    pad = lambda vec: jnp.pad(vec.astype(jnp.float32), (0, F - vec.shape[0]))
    vecs = jnp.stack([pad(bqkv_s), pad(bo), pad(b1), pad(b2),
                      pad(g1), pad(be1), pad(g2), pad(be2)], axis=0)   # (8, 4H)

    full = lambda arr: pl.BlockSpec(arr.shape, lambda b: (0,) * arr.ndim)

    out = pl.pallas_call(
        functools.partial(_gst_layer_kernel, num_heads=num_heads, eps=eps),
        out_shape=jax.ShapeDtypeStruct((B, S, H), jnp.float32),
        grid=(B,),
        in_specs=[
            pl.BlockSpec((1, S, H), lambda b: (b, 0, 0)),   # x
            full(wqkv_t), full(wo_t), full(w1_t), full(w2_t),
            full(vecs),
        ],
        out_specs=pl.BlockSpec((1, S, H), lambda b: (b, 0, 0)),
        scratch_shapes=[pltpu.VMEM((S, H), jnp.bfloat16)],  # per-head ctx slab
        compiler_params=pltpu.CompilerParams(
            dimension_semantics=("parallel",),
            vmem_limit_bytes=32 * 1024 * 1024,
        ),
    )(x, wqkv_t, wo_t, w1_t, w2_t, vecs)

    return jnp.transpose(out, (1, 0, 2))                  # back to (S, B, H)


def gst_layer_reference(hidden_states_sbh, params, num_heads, eps=1e-5):
    """Plain-JAX f32 reference with identical semantics (correctness check)."""
    (wqkv, bqkv, wo, bo, w1, b1, w2, b2, g1, be1, g2, be2) = params
    S, B, H = hidden_states_sbh.shape
    hd = H // num_heads
    x = jnp.transpose(hidden_states_sbh, (1, 0, 2))       # (B, S, H)

    qkv = jnp.einsum('bsh,oh->bso', x, wqkv) + bqkv
    q, k, v = qkv[..., :H], qkv[..., H:2 * H], qkv[..., 2 * H:]
    qh = q.reshape(B, S, num_heads, hd) / math.sqrt(hd)
    kh = k.reshape(B, S, num_heads, hd)
    vh = v.reshape(B, S, num_heads, hd)
    sc = jnp.einsum('bqnd,bknd->bnqk', qh, kh)
    p = jax.nn.softmax(sc, axis=-1)
    ctx = jnp.einsum('bnqk,bknd->bqnd', p, vh).reshape(B, S, H)
    attn = jnp.einsum('bsh,oh->bso', ctx, wo) + bo

    def ln(y, g, b):
        mu = jnp.mean(y, -1, keepdims=True)
        var = jnp.mean((y - mu) ** 2, -1, keepdims=True)
        return (y - mu) * jax.lax.rsqrt(var + eps) * g + b

    h1 = ln(x + attn, g1, be1)
    ff = jnp.maximum(jnp.einsum('bsh,oh->bso', h1, w1) + b1, 0.0)
    ff = jnp.einsum('bsf,of->bso', ff, w2) + b2
    out = ln(h1 + ff, g2, be2)
    return jnp.transpose(out, (1, 0, 2))


def make_params(key, hidden_size):
    H = hidden_size
    ks = jax.random.split(key, 12)
    n = lambda k, shp, s=0.05: (s * jax.random.normal(k, shp)).astype(jnp.float32)
    wqkv = n(ks[0], (3 * H, H))              # in_proj_weight
    bqkv = n(ks[1], (3 * H,))                # in_proj_bias
    wo = n(ks[2], (H, H))                    # out_proj.weight
    bo = n(ks[3], (H,))                      # out_proj.bias
    w1 = n(ks[4], (4 * H, H))                # linear1.weight
    b1 = n(ks[5], (4 * H,))                  # linear1.bias
    w2 = n(ks[6], (H, 4 * H))                # linear2.weight
    b2 = n(ks[7], (H,))                      # linear2.bias
    g1 = (1.0 + 0.1 * jax.random.normal(ks[8], (H,))).astype(jnp.float32)
    be1 = n(ks[9], (H,), 0.02)
    g2 = (1.0 + 0.1 * jax.random.normal(ks[10], (H,))).astype(jnp.float32)
    be2 = n(ks[11], (H,), 0.02)
    return (wqkv, bqkv, wo, bo, w1, b1, w2, b2, g1, be1, g2, be2)


if __name__ == "__main__":
    SEQ, BATCH, HIDDEN, NUM_HEADS = 8, 2, 32, 4

    key = jax.random.PRNGKey(0)
    k_x, k_p = jax.random.split(key)
    hidden_states = jax.random.normal(k_x, (SEQ, BATCH, HIDDEN), dtype=jnp.float32)
    params = make_params(k_p, HIDDEN)

    out = gst_layer_pallas(hidden_states, params, NUM_HEADS)
    out = jax.block_until_ready(out)

    ref = jax.block_until_ready(gst_layer_reference(hidden_states, params, NUM_HEADS))
    # Tolerance accounts for bf16 MXU operands (f32 accumulation) + approx recip.
    np.testing.assert_allclose(np.asarray(out), np.asarray(ref), atol=2e-2, rtol=2e-2)

    print("KERNEL_OK")
</pallas_src>

<mosaic_0001>
module attributes {stable_mosaic.version = 11 : i64} {
  func.func @_gst_layer_kernel(%arg0: i32, %arg1: memref<1x8x32xf32, #tpu.memory_space<vmem>>, %arg2: memref<32x96xbf16, #tpu.memory_space<vmem>>, %arg3: memref<32x32xbf16, #tpu.memory_space<vmem>>, %arg4: memref<32x128xbf16, #tpu.memory_space<vmem>>, %arg5: memref<128x32xbf16, #tpu.memory_space<vmem>>, %arg6: memref<8x128xf32, #tpu.memory_space<vmem>>, %arg7: memref<1x8x32xf32, #tpu.memory_space<vmem>>, %arg8: memref<8x32xbf16, #tpu.memory_space<vmem>>) attributes {dimension_semantics = [#tpu.dimension_semantics<parallel>], iteration_bounds = array<i64: 2>, scalar_prefetch = 0 : i64, scratch_operands = 1 : i64, tpu.core_type = #tpu.core_type<tc>, window_params = [{transform_indices = @transform_0, window_bounds = array<i64: 1, 8, 32>}, {pipeline_mode = #tpu.pipeline_mode<synchronous>, transform_indices = @transform_1, window_bounds = array<i64: 32, 96>}, {pipeline_mode = #tpu.pipeline_mode<synchronous>, transform_indices = @transform_2, window_bounds = array<i64: 32, 32>}, {pipeline_mode = #tpu.pipeline_mode<synchronous>, transform_indices = @transform_3, window_bounds = array<i64: 32, 128>}, {pipeline_mode = #tpu.pipeline_mode<synchronous>, transform_indices = @transform_4, window_bounds = array<i64: 128, 32>}, {pipeline_mode = #tpu.pipeline_mode<synchronous>, transform_indices = @transform_5, window_bounds = array<i64: 8, 128>}, {transform_indices = @transform_6, window_bounds = array<i64: 1, 8, 32>}]} {
    %c0 = arith.constant 0 : index
    %c0_0 = arith.constant 0 : index
    %c0_1 = arith.constant 0 : index
    %0 = vector.load %arg1[%c0, %c0_0, %c0_1] : memref<1x8x32xf32, #tpu.memory_space<vmem>>, vector<1x8x32xf32>
    %1 = vector.shape_cast %0 : vector<1x8x32xf32> to vector<8x32xf32>
    %c0_2 = arith.constant 0 : index
    %c0_3 = arith.constant 0 : index
    %2 = vector.load %arg6[%c0_2, %c0_3] : memref<8x128xf32, #tpu.memory_space<vmem>>, vector<8x128xf32>
    %3 = vector.extract_strided_slice %2 {offsets = [0, 0], sizes = [1, 96], strides = [1, 1]} : vector<8x128xf32> to vector<1x96xf32>
    %4 = vector.extract_strided_slice %2 {offsets = [1, 0], sizes = [1, 32], strides = [1, 1]} : vector<8x128xf32> to vector<1x32xf32>
    %5 = vector.extract_strided_slice %2 {offsets = [2, 0], sizes = [1, 128], strides = [1, 1]} : vector<8x128xf32> to vector<1x128xf32>
    %6 = vector.extract_strided_slice %2 {offsets = [3, 0], sizes = [1, 32], strides = [1, 1]} : vector<8x128xf32> to vector<1x32xf32>
    %7 = vector.extract_strided_slice %2 {offsets = [4, 0], sizes = [1, 32], strides = [1, 1]} : vector<8x128xf32> to vector<1x32xf32>
    %8 = vector.extract_strided_slice %2 {offsets = [5, 0], sizes = [1, 32], strides = [1, 1]} : vector<8x128xf32> to vector<1x32xf32>
    %9 = vector.extract_strided_slice %2 {offsets = [6, 0], sizes = [1, 32], strides = [1, 1]} : vector<8x128xf32> to vector<1x32xf32>
    %10 = vector.extract_strided_slice %2 {offsets = [7, 0], sizes = [1, 32], strides = [1, 1]} : vector<8x128xf32> to vector<1x32xf32>
    %11 = arith.truncf %1 : vector<8x32xf32> to vector<8x32xbf16>
    %c0_4 = arith.constant 0 : index
    %c0_5 = arith.constant 0 : index
    %12 = vector.load %arg2[%c0_4, %c0_5] : memref<32x96xbf16, #tpu.memory_space<vmem>>, vector<32x96xbf16>
    %cst = arith.constant dense<0.000000e+00> : vector<8x96xf32>
    %13 = tpu.matmul %11, %12, %cst {dimension_numbers = #tpu.dot_dimension_numbers<[1], [0], [0], [1], [0, 0, 1, 1], [], []>} : vector<8x32xbf16>, vector<32x96xbf16>, vector<8x96xf32> -> vector<8x96xf32>
    %14 = vector.broadcast %3 : vector<1x96xf32> to vector<8x96xf32>
    %15 = arith.addf %13, %14 : vector<8x96xf32>
    %16 = arith.truncf %15 : vector<8x96xf32> to vector<8x96xbf16>
    %17 = vector.extract_strided_slice %16 {offsets = [0, 0], sizes = [8, 32], strides = [1, 1]} : vector<8x96xbf16> to vector<8x32xbf16>
    %18 = vector.extract_strided_slice %16 {offsets = [0, 32], sizes = [8, 32], strides = [1, 1]} : vector<8x96xbf16> to vector<8x32xbf16>
    %19 = vector.extract_strided_slice %16 {offsets = [0, 64], sizes = [8, 32], strides = [1, 1]} : vector<8x96xbf16> to vector<8x32xbf16>
    %20 = vector.extract_strided_slice %17 {offsets = [0, 0], sizes = [8, 8], strides = [1, 1]} : vector<8x32xbf16> to vector<8x8xbf16>
    %21 = vector.extract_strided_slice %18 {offsets = [0, 0], sizes = [8, 8], strides = [1, 1]} : vector<8x32xbf16> to vector<8x8xbf16>
    "tpu.trace_start"() <{level = 10 : i32, message = "qd,kd->qk"}> : () -> ()
    %cst_6 = arith.constant dense<0.000000e+00> : vector<8x8xf32>
    %22 = tpu.matmul %20, %21, %cst_6 {dimension_numbers = #tpu.dot_dimension_numbers<[1], [1], [0], [0], [0, 0, 1, 0], [], []>} : vector<8x8xbf16>, vector<8x8xbf16>, vector<8x8xf32> -> vector<8x8xf32>
    "tpu.trace_stop"() : () -> ()
    %cst_7 = arith.constant dense<0xFF800000> : vector<8xf32>
    %23 = vector.multi_reduction <maximumf>, %22, %cst_7 [1] : vector<8x8xf32> to vector<8xf32>
    %24 = vector.shape_cast %23 : vector<8xf32> to vector<8x1xf32>
    %25 = vector.broadcast %24 : vector<8x1xf32> to vector<8x8xf32>
    %26 = arith.subf %22, %25 : vector<8x8xf32>
    %27 = math.exp %26 : vector<8x8xf32>
    %cst_8 = arith.constant dense<0.000000e+00> : vector<8xf32>
    %28 = vector.multi_reduction <add>, %27, %cst_8 [1] : vector<8x8xf32> to vector<8xf32>
    %29 = vector.shape_cast %28 : vector<8xf32> to vector<8x1xf32>
    %30 = tpu.reciprocal %29 {approx = true} : vector<8x1xf32> -> vector<8x1xf32>
    %31 = vector.broadcast %30 : vector<8x1xf32> to vector<8x8xf32>
    %32 = arith.mulf %27, %31 : vector<8x8xf32>
    %33 = arith.truncf %32 : vector<8x8xf32> to vector<8x8xbf16>
    %34 = vector.extract_strided_slice %19 {offsets = [0, 0], sizes = [8, 8], strides = [1, 1]} : vector<8x32xbf16> to vector<8x8xbf16>
    %cst_9 = arith.constant dense<0.000000e+00> : vector<8x8xf32>
    %35 = tpu.matmul %33, %34, %cst_9 {dimension_numbers = #tpu.dot_dimension_numbers<[1], [0], [0], [1], [0, 0, 1, 1], [], []>} : vector<8x8xbf16>, vector<8x8xbf16>, vector<8x8xf32> -> vector<8x8xf32>
    %36 = arith.truncf %35 : vector<8x8xf32> to vector<8x8xbf16>
    %c0_10 = arith.constant 0 : index
    %c0_11 = arith.constant 0 : index
    %37 = vector.load %arg8[%c0_10, %c0_11] : memref<8x32xbf16, #tpu.memory_space<vmem>>, vector<8x8xbf16>
    tpu.vector_store %arg8[%c0_10, %c0_11], %36 {strides = array<i32>} : memref<8x32xbf16, #tpu.memory_space<vmem>>, vector<8x8xbf16>,
    %38 = vector.extract_strided_slice %17 {offsets = [0, 8], sizes = [8, 8], strides = [1, 1]} : vector<8x32xbf16> to vector<8x8xbf16>
    %39 = vector.extract_strided_slice %18 {offsets = [0, 8], sizes = [8, 8], strides = [1, 1]} : vector<8x32xbf16> to vector<8x8xbf16>
    "tpu.trace_start"() <{level = 10 : i32, message = "qd,kd->qk"}> : () -> ()
    %cst_12 = arith.constant dense<0.000000e+00> : vector<8x8xf32>
    %40 = tpu.matmul %38, %39, %cst_12 {dimension_numbers = #tpu.dot_dimension_numbers<[1], [1], [0], [0], [0, 0, 1, 0], [], []>} : vector<8x8xbf16>, vector<8x8xbf16>, vector<8x8xf32> -> vector<8x8xf32>
    "tpu.trace_stop"() : () -> ()
    %cst_13 = arith.constant dense<0xFF800000> : vector<8xf32>
    %41 = vector.multi_reduction <maximumf>, %40, %cst_13 [1] : vector<8x8xf32> to vector<8xf32>
    %42 = vector.shape_cast %41 : vector<8xf32> to vector<8x1xf32>
    %43 = vector.broadcast %42 : vector<8x1xf32> to vector<8x8xf32>
    %44 = arith.subf %40, %43 : vector<8x8xf32>
    %45 = math.exp %44 : vector<8x8xf32>
    %cst_14 = arith.constant dense<0.000000e+00> : vector<8xf32>
    %46 = vector.multi_reduction <add>, %45, %cst_14 [1] : vector<8x8xf32> to vector<8xf32>
    %47 = vector.shape_cast %46 : vector<8xf32> to vector<8x1xf32>
    %48 = tpu.reciprocal %47 {approx = true} : vector<8x1xf32> -> vector<8x1xf32>
    %49 = vector.broadcast %48 : vector<8x1xf32> to vector<8x8xf32>
    %50 = arith.mulf %45, %49 : vector<8x8xf32>
    %51 = arith.truncf %50 : vector<8x8xf32> to vector<8x8xbf16>
    %52 = vector.extract_strided_slice %19 {offsets = [0, 8], sizes = [8, 8], strides = [1, 1]} : vector<8x32xbf16> to vector<8x8xbf16>
    %cst_15 = arith.constant dense<0.000000e+00> : vector<8x8xf32>
    %53 = tpu.matmul %51, %52, %cst_15 {dimension_numbers = #tpu.dot_dimension_numbers<[1], [0], [0], [1], [0, 0, 1, 1], [], []>} : vector<8x8xbf16>, vector<8x8xbf16>, vector<8x8xf32> -> vector<8x8xf32>
    %54 = arith.truncf %53 : vector<8x8xf32> to vector<8x8xbf16>
    %c0_16 = arith.constant 0 : index
    %c8 = arith.constant 8 : index
    %55 = vector.load %arg8[%c0_16, %c8] : memref<8x32xbf16, #tpu.memory_space<vmem>>, vector<8x8xbf16>
    tpu.vector_store %arg8[%c0_16, %c8], %54 {strides = array<i32>} : memref<8x32xbf16, #tpu.memory_space<vmem>>, vector<8x8xbf16>,
    %56 = vector.extract_strided_slice %17 {offsets = [0, 16], sizes = [8, 8], strides = [1, 1]} : vector<8x32xbf16> to vector<8x8xbf16>
    %57 = vector.extract_strided_slice %18 {offsets = [0, 16], sizes = [8, 8], strides = [1, 1]} : vector<8x32xbf16> to vector<8x8xbf16>
    "tpu.trace_start"() <{level = 10 : i32, message = "qd,kd->qk"}> : () -> ()
    %cst_17 = arith.constant dense<0.000000e+00> : vector<8x8xf32>
    %58 = tpu.matmul %56, %57, %cst_17 {dimension_numbers = #tpu.dot_dimension_numbers<[1], [1], [0], [0], [0, 0, 1, 0], [], []>} : vector<8x8xbf16>, vector<8x8xbf16>, vector<8x8xf32> -> vector<8x8xf32>
    "tpu.trace_stop"() : () -> ()
    %cst_18 = arith.constant dense<0xFF800000> : vector<8xf32>
    %59 = vector.multi_reduction <maximumf>, %58, %cst_18 [1] : vector<8x8xf32> to vector<8xf32>
    %60 = vector.shape_cast %59 : vector<8xf32> to vector<8x1xf32>
    %61 = vector.broadcast %60 : vector<8x1xf32> to vector<8x8xf32>
    %62 = arith.subf %58, %61 : vector<8x8xf32>
    %63 = math.exp %62 : vector<8x8xf32>
    %cst_19 = arith.constant dense<0.000000e+00> : vector<8xf32>
    %64 = vector.multi_reduction <add>, %63, %cst_19 [1] : vector<8x8xf32> to vector<8xf32>
    %65 = vector.shape_cast %64 : vector<8xf32> to vector<8x1xf32>
    %66 = tpu.reciprocal %65 {approx = true} : vector<8x1xf32> -> vector<8x1xf32>
    %67 = vector.broadcast %66 : vector<8x1xf32> to vector<8x8xf32>
    %68 = arith.mulf %63, %67 : vector<8x8xf32>
    %69 = arith.truncf %68 : vector<8x8xf32> to vector<8x8xbf16>
    %70 = vector.extract_strided_slice %19 {offsets = [0, 16], sizes = [8, 8], strides = [1, 1]} : vector<8x32xbf16> to vector<8x8xbf16>
    %cst_20 = arith.constant dense<0.000000e+00> : vector<8x8xf32>
    %71 = tpu.matmul %69, %70, %cst_20 {dimension_numbers = #tpu.dot_dimension_numbers<[1], [0], [0], [1], [0, 0, 1, 1], [], []>} : vector<8x8xbf16>, vector<8x8xbf16>, vector<8x8xf32> -> vector<8x8xf32>
    %72 = arith.truncf %71 : vector<8x8xf32> to vector<8x8xbf16>
    %c0_21 = arith.constant 0 : index
    %c16 = arith.constant 16 : index
    %73 = vector.load %arg8[%c0_21, %c16] : memref<8x32xbf16, #tpu.memory_space<vmem>>, vector<8x8xbf16>
    tpu.vector_store %arg8[%c0_21, %c16], %72 {strides = array<i32>} : memref<8x32xbf16, #tpu.memory_space<vmem>>, vector<8x8xbf16>,
    %74 = vector.extract_strided_slice %17 {offsets = [0, 24], sizes = [8, 8], strides = [1, 1]} : vector<8x32xbf16> to vector<8x8xbf16>
    %75 = vector.extract_strided_slice %18 {offsets = [0, 24], sizes = [8, 8], strides = [1, 1]} : vector<8x32xbf16> to vector<8x8xbf16>
    "tpu.trace_start"() <{level = 10 : i32, message = "qd,kd->qk"}> : () -> ()
    %cst_22 = arith.constant dense<0.000000e+00> : vector<8x8xf32>
    %76 = tpu.matmul %74, %75, %cst_22 {dimension_numbers = #tpu.dot_dimension_numbers<[1], [1], [0], [0], [0, 0, 1, 0], [], []>} : vector<8x8xbf16>, vector<8x8xbf16>, vector<8x8xf32> -> vector<8x8xf32>
    "tpu.trace_stop"() : () -> ()
    %cst_23 = arith.constant dense<0xFF800000> : vector<8xf32>
    %77 = vector.multi_reduction <maximumf>, %76, %cst_23 [1] : vector<8x8xf32> to vector<8xf32>
    %78 = vector.shape_cast %77 : vector<8xf32> to vector<8x1xf32>
    %79 = vector.broadcast %78 : vector<8x1xf32> to vector<8x8xf32>
    %80 = arith.subf %76, %79 : vector<8x8xf32>
    %81 = math.exp %80 : vector<8x8xf32>
    %cst_24 = arith.constant dense<0.000000e+00> : vector<8xf32>
    %82 = vector.multi_reduction <add>, %81, %cst_24 [1] : vector<8x8xf32> to vector<8xf32>
    %83 = vector.shape_cast %82 : vector<8xf32> to vector<8x1xf32>
    %84 = tpu.reciprocal %83 {approx = true} : vector<8x1xf32> -> vector<8x1xf32>
    %85 = vector.broadcast %84 : vector<8x1xf32> to vector<8x8xf32>
    %86 = arith.mulf %81, %85 : vector<8x8xf32>
    %87 = arith.truncf %86 : vector<8x8xf32> to vector<8x8xbf16>
    %88 = vector.extract_strided_slice %19 {offsets = [0, 24], sizes = [8, 8], strides = [1, 1]} : vector<8x32xbf16> to vector<8x8xbf16>
    %cst_25 = arith.constant dense<0.000000e+00> : vector<8x8xf32>
    %89 = tpu.matmul %87, %88, %cst_25 {dimension_numbers = #tpu.dot_dimension_numbers<[1], [0], [0], [1], [0, 0, 1, 1], [], []>} : vector<8x8xbf16>, vector<8x8xbf16>, vector<8x8xf32> -> vector<8x8xf32>
    %90 = arith.truncf %89 : vector<8x8xf32> to vector<8x8xbf16>
    %c0_26 = arith.constant 0 : index
    %c24 = arith.constant 24 : index
    %91 = vector.load %arg8[%c0_26, %c24] : memref<8x32xbf16, #tpu.memory_space<vmem>>, vector<8x8xbf16>
    tpu.vector_store %arg8[%c0_26, %c24], %90 {strides = array<i32>} : memref<8x32xbf16, #tpu.memory_space<vmem>>, vector<8x8xbf16>,
    %c0_27 = arith.constant 0 : index
    %c0_28 = arith.constant 0 : index
    %92 = vector.load %arg8[%c0_27, %c0_28] : memref<8x32xbf16, #tpu.memory_space<vmem>>, vector<8x32xbf16>
    %c0_29 = arith.constant 0 : index
    %c0_30 = arith.constant 0 : index
    %93 = vector.load %arg3[%c0_29, %c0_30] : memref<32x32xbf16, #tpu.memory_space<vmem>>, vector<32x32xbf16>
    %cst_31 = arith.constant dense<0.000000e+00> : vector<8x32xf32>
    %94 = tpu.matmul %92, %93, %cst_31 {dimension_numbers = #tpu.dot_dimension_numbers<[1], [0], [0], [1], [0, 0, 1, 1], [], []>} : vector<8x32xbf16>, vector<32x32xbf16>, vector<8x32xf32> -> vector<8x32xf32>
    %95 = vector.broadcast %4 : vector<1x32xf32> to vector<8x32xf32>
    %96 = arith.addf %94, %95 : vector<8x32xf32>
    %97 = arith.addf %1, %96 : vector<8x32xf32>
    %cst_32 = arith.constant dense<0.000000e+00> : vector<8xf32>
    %98 = vector.multi_reduction <add>, %97, %cst_32 [1] : vector<8x32xf32> to vector<8xf32>
    %99 = vector.shape_cast %98 : vector<8xf32> to vector<8x1xf32>
    %cst_33 = arith.constant 3.200000e+01 : f32
    %100 = vector.broadcast %cst_33 : f32 to vector<8x1xf32>
    %101 = arith.divf %99, %100 : vector<8x1xf32>
    %102 = vector.broadcast %101 : vector<8x1xf32> to vector<8x32xf32>
    %103 = arith.subf %97, %102 : vector<8x32xf32>
    %104 = arith.mulf %103, %103 : vector<8x32xf32>
    %cst_34 = arith.constant dense<0.000000e+00> : vector<8xf32>
    %105 = vector.multi_reduction <add>, %104, %cst_34 [1] : vector<8x32xf32> to vector<8xf32>
    %106 = vector.shape_cast %105 : vector<8xf32> to vector<8x1xf32>
    %cst_35 = arith.constant 3.200000e+01 : f32
    %107 = vector.broadcast %cst_35 : f32 to vector<8x1xf32>
    %108 = arith.divf %106, %107 : vector<8x1xf32>
    %cst_36 = arith.constant 9.99999974E-6 : f32
    %109 = vector.broadcast %cst_36 : f32 to vector<8x1xf32>
    %110 = arith.addf %108, %109 : vector<8x1xf32>
    %111 = math.rsqrt %110 : vector<8x1xf32>
    %112 = vector.broadcast %111 : vector<8x1xf32> to vector<8x32xf32>
    %113 = arith.mulf %103, %112 : vector<8x32xf32>
    %114 = vector.broadcast %7 : vector<1x32xf32> to vector<8x32xf32>
    %115 = arith.mulf %113, %114 : vector<8x32xf32>
    %116 = vector.broadcast %8 : vector<1x32xf32> to vector<8x32xf32>
    %117 = arith.addf %115, %116 : vector<8x32xf32>
    %118 = arith.truncf %117 : vector<8x32xf32> to vector<8x32xbf16>
    %c0_37 = arith.constant 0 : index
    %c0_38 = arith.constant 0 : index
    %119 = vector.load %arg4[%c0_37, %c0_38] : memref<32x128xbf16, #tpu.memory_space<vmem>>, vector<32x128xbf16>
    %cst_39 = arith.constant dense<0.000000e+00> : vector<8x128xf32>
    %120 = tpu.matmul %118, %119, %cst_39 {dimension_numbers = #tpu.dot_dimension_numbers<[1], [0], [0], [1], [0, 0, 1, 1], [], []>} : vector<8x32xbf16>, vector<32x128xbf16>, vector<8x128xf32> -> vector<8x128xf32>
    %121 = vector.broadcast %5 : vector<1x128xf32> to vector<8x128xf32>
    %122 = arith.addf %120, %121 : vector<8x128xf32>
    %cst_40 = arith.constant 0.000000e+00 : f32
    %123 = vector.broadcast %cst_40 : f32 to vector<8x128xf32>
    %124 = arith.maximumf %122, %123 : vector<8x128xf32>
    %125 = arith.truncf %124 : vector<8x128xf32> to vector<8x128xbf16>
    %c0_41 = arith.constant 0 : index
    %c0_42 = arith.constant 0 : index
    %126 = vector.load %arg5[%c0_41, %c0_42] : memref<128x32xbf16, #tpu.memory_space<vmem>>, vector<128x32xbf16>
    %cst_43 = arith.constant dense<0.000000e+00> : vector<8x32xf32>
    %127 = tpu.matmul %125, %126, %cst_43 {dimension_numbers = #tpu.dot_dimension_numbers<[1], [0], [0], [1], [0, 0, 1, 1], [], []>} : vector<8x128xbf16>, vector<128x32xbf16>, vector<8x32xf32> -> vector<8x32xf32>
    %128 = vector.broadcast %6 : vector<1x32xf32> to vector<8x32xf32>
    %129 = arith.addf %127, %128 : vector<8x32xf32>
    %130 = arith.addf %117, %129 : vector<8x32xf32>
    %cst_44 = arith.constant dense<0.000000e+00> : vector<8xf32>
    %131 = vector.multi_reduction <add>, %130, %cst_44 [1] : vector<8x32xf32> to vector<8xf32>
    %132 = vector.shape_cast %131 : vector<8xf32> to vector<8x1xf32>
    %cst_45 = arith.constant 3.200000e+01 : f32
    %133 = vector.broadcast %cst_45 : f32 to vector<8x1xf32>
    %134 = arith.divf %132, %133 : vector<8x1xf32>
    %135 = vector.broadcast %134 : vector<8x1xf32> to vector<8x32xf32>
    %136 = arith.subf %130, %135 : vector<8x32xf32>
    %137 = arith.mulf %136, %136 : vector<8x32xf32>
    %cst_46 = arith.constant dense<0.000000e+00> : vector<8xf32>
    %138 = vector.multi_reduction <add>, %137, %cst_46 [1] : vector<8x32xf32> to vector<8xf32>
    %139 = vector.shape_cast %138 : vector<8xf32> to vector<8x1xf32>
    %cst_47 = arith.constant 3.200000e+01 : f32
    %140 = vector.broadcast %cst_47 : f32 to vector<8x1xf32>
    %141 = arith.divf %139, %140 : vector<8x1xf32>
    %cst_48 = arith.constant 9.99999974E-6 : f32
    %142 = vector.broadcast %cst_48 : f32 to vector<8x1xf32>
    %143 = arith.addf %141, %142 : vector<8x1xf32>
    %144 = math.rsqrt %143 : vector<8x1xf32>
    %145 = vector.broadcast %144 : vector<8x1xf32> to vector<8x32xf32>
    %146 = arith.mulf %136, %145 : vector<8x32xf32>
    %147 = vector.broadcast %9 : vector<1x32xf32> to vector<8x32xf32>
    %148 = arith.mulf %146, %147 : vector<8x32xf32>
    %149 = vector.broadcast %10 : vector<1x32xf32> to vector<8x32xf32>
    %150 = arith.addf %148, %149 : vector<8x32xf32>
    %c0_49 = arith.constant 0 : index
    %c0_50 = arith.constant 0 : index
    %c0_51 = arith.constant 0 : index
    %151 = vector.load %arg7[%c0_49, %c0_50, %c0_51] : memref<1x8x32xf32, #tpu.memory_space<vmem>>, vector<1x8x32xf32>
    %152 = vector.shape_cast %151 : vector<1x8x32xf32> to vector<8x32xf32>
    %153 = vector.shape_cast %150 : vector<8x32xf32> to vector<1x8x32xf32>
    tpu.vector_store %arg7[%c0_49, %c0_50, %c0_51], %153 {strides = array<i32>} : memref<1x8x32xf32, #tpu.memory_space<vmem>>, vector<1x8x32xf32>,
    return
  }
  func.func @transform_0(%arg0: i32) -> (i32, i32, i32) {
    %c0_i32 = arith.constant 0 : i32
    %c0_i32_0 = arith.constant 0 : i32
    %c0_i32_1 = arith.constant 0 : i32
    return %arg0, %c0_i32, %c0_i32_0 : i32, i32, i32
  }
  func.func @transform_1(%arg0: i32) -> (i32, i32) {
    %c0_i32 = arith.constant 0 : i32
    %c0_i32_0 = arith.constant 0 : i32
    %c0_i32_1 = arith.constant 0 : i32
    return %c0_i32, %c0_i32_0 : i32, i32
  }
  func.func @transform_2(%arg0: i32) -> (i32, i32) {
    %c0_i32 = arith.constant 0 : i32
    %c0_i32_0 = arith.constant 0 : i32
    %c0_i32_1 = arith.constant 0 : i32
    return %c0_i32, %c0_i32_0 : i32, i32
  }
  func.func @transform_3(%arg0: i32) -> (i32, i32) {
    %c0_i32 = arith.constant 0 : i32
    %c0_i32_0 = arith.constant 0 : i32
    %c0_i32_1 = arith.constant 0 : i32
    return %c0_i32, %c0_i32_0 : i32, i32
  }
  func.func @transform_4(%arg0: i32) -> (i32, i32) {
    %c0_i32 = arith.constant 0 : i32
    %c0_i32_0 = arith.constant 0 : i32
    %c0_i32_1 = arith.constant 0 : i32
    return %c0_i32, %c0_i32_0 : i32, i32
  }
  func.func @transform_5(%arg0: i32) -> (i32, i32) {
    %c0_i32 = arith.constant 0 : i32
    %c0_i32_0 = arith.constant 0 : i32
    %c0_i32_1 = arith.constant 0 : i32
    return %c0_i32, %c0_i32_0 : i32, i32
  }
  func.func @transform_6(%arg0: i32) -> (i32, i32, i32) {
    %c0_i32 = arith.constant 0 : i32
    %c0_i32_0 = arith.constant 0 : i32
    %c0_i32_1 = arith.constant 0 : i32
    return %arg0, %c0_i32, %c0_i32_0 : i32, i32, i32
  }
}

</mosaic_0001>

<bundles_post_ra>
// kernel: tpu_custom_call.1
= control target key start
LH: loop header
LB: loop body
LE: loop exit
PB: predicated region body
PF: predicated region fallthrough
CT: control target
= control target key end

     0   :  { %11 = vsyncpa [#allocation4], 0  ;;  %s1782_s0 = inlined_call_operand.vmem [shape: f32[2,8,32], index: 0, kind: input, shape index: {}]   ;;  %s1783_s1 = inlined_call_operand.vmem [shape: bf16[32,96], index: 1, kind: input, shape index: {}]   ;;  %s1784_s2 = inlined_call_operand.vmem [shape: bf16[32,32], index: 2, kind: input, shape index: {}]   ;;  %s1785_s3 = inlined_call_operand.vmem [shape: bf16[32,128], index: 3, kind: input, shape index: {}]   ;;  %s1786_s4 = inlined_call_operand.vmem [shape: bf16[128,32], index: 4, kind: input, shape index: {}]   ;;  %s1787_s5 = inlined_call_operand.vmem [shape: f32[8,128], index: 5, kind: input, shape index: {}]   ;;  %s1788_s6 = inlined_call_operand.hbm [shape: f32[2,8,32], index: 6, kind: output, shape index: {}]  }
   0x1   :  { %13 = vsyncpa [#allocation4 + $0x1], 0  ;;  %s1520_s21 = smov 0   ;;  %s1522_s22 = smov 0  }
   0x2   :  { %s1524_s23 = smov 0   ;;  %s1526_s24 = smov 0  }
   0x3 LB: > { %s1541_s25 = sadd.s32 4294967295, %s1466_s24   ;;  %s1148_s26 = sadd.s32 4294967294, %s1466_s24   ;;  %s1466_s24 = sphi %s1526_s24, %s1794_s24   ;;  %s1462_s23 = sphi %s1524_s23, %s1793_s23   ;;  %s1458_s22 = sphi %s1522_s22, %s1792_s22   ;;  %s1454_s21 = sphi %s1520_s21, %s1791_s21  }
   0x4   : > { %s1545_s27 = sadd.s32 1, %s1466_s24   ;;  %s157_s28 = sadd.s32 1, %s1462_s23 }
   0x5   : > { %s154_s29 = ssub.s32 %s1466_s24, %s1545_s27  ;;  %p167_p0 = scmp.ne.s32.totalorder %s1462_s23, %s1458_s22 }
   0x6   : > { %p155_p1 = scmp.eq.s32.totalorder %s154_s29, 0  ;;  %p168_p2 = scmp.eq.s32.totalorder %s1541_s25, 1 }
   0x7   : > { %p173_p3 = scmp.ne.s32.totalorder %s1458_s22, %s1454_s21  ;;  %p174_p4 = scmp.eq.s32.totalorder %s1148_s26, 1 }
   0x8   : > { %s1556_s30 = scalar_select %p155_p1, %s1462_s23, %s157_s28  }
   0x9   : > { %p1558_p5 = por %p168_p2, %p167_p0  ;;  %p1562_p6 = por %p174_p4, %p173_p3 }
   0xa   : > { %p1151_p7 = scmp.ge.s32.totalorder %s1466_s24, 1  ;;  %p214_p8 = scmp.lt.s32.totalorder %s1466_s24, 3 }
   0xc   : > { %p215_p9 = pnand %p1151_p7, %p214_p8 }
   0xd   : > { %v1370_v0 = vld [vmem:[%s1783_s1] sm:$0xff] (!%p215_p9)   ;;  %v1468_v1 = vmov (!%p215_p9), 0.0   ;;  %v1371_v2 = vld [vmem:[%s1783_s1 + $0x8] sm:$0xff] (!%p215_p9)   ;;  %vm1469_vm0 = vmmov (!%p215_p9), 0   ;;  %p243_p10 = scmp.lt.s32.totalorder (!%p215_p9), %s1541_s25, 1  ;;  %vm271_vm1 = vcmask (!%p215_p9), 261120   ;;  %v255_v5 = vlaneseq (!%p215_p9) }
   0xe   : > { %218 = sbr.rel (%p215_p9) target bundleno = 2582 (0xa16), region = 44  ;;  %1223 = vmatprep.subr.bf16.mxu0 (!%p215_p9), %v1468_v1  ;;  %1243 = vmatprep.subr.bf16.mxu1 (!%p215_p9), %v1468_v1  ;;  %v1600_v8 = vld [vmem:[%s1787_s5] sm:$0xff] (!%p215_p9)  ;;  %s1470_s20 = smov (!%p215_p9), 120   ;;  %vm319_vm2 = vcmask (!%p215_p9), 64512   ;;  %vm383_vm3 = vcmask (!%p215_p9), 1043456   ;;  %vm428_vm4 = vcmask (!%p215_p9), 60416  }
   0xf   : > { %1224 = vmatpush3.bf16.msra.mxu0 (!%p215_p9), %v1370_v0  ;;  %1227 = vmatprep.mubr.msk.bf16.mxu0 (!%p215_p9), %vm1469_vm0, %v1468_v1  ;;  %v1594_v6 = vshrl.u32 (!%p215_p9), %v255_v5, 7  ;;  %s1471_s26 = smov (!%p215_p9), 96   ;;  %s1472_s28 = smov (!%p215_p9), 80   ;;  %vm547_vm5 = vcmask (!%p215_p9), 126016   ;;  %vm666_vm6 = vcmask (!%p215_p9), 191616   ;;  %vm785_vm7 = vcmask (!%p215_p9), 257216  }
  0x10   : > { %1225 = vmatprep.subr.bf16.mxu0 (!%p215_p9), %v1468_v1  ;;  %1245 = vmatprep.mubr.msk.bf16.mxu1 (!%p215_p9), %vm1469_vm0, %v1468_v1  ;;  %s1473_s29 = smov (!%p215_p9), 88   ;;  %s1474_s9 = smov (!%p215_p9), 72  }
  0x11   : > { %v257_v7 = vsub.s32 (!%p215_p9), 0, %v1594_v6  ;;  %s1475_s10 = smov (!%p215_p9), 112   ;;  %s1476_s11 = smov (!%p215_p9), 104  }
  0x12   : > { %s1477_s12 = smov (!%p215_p9), 56   ;;  %s1480_s15 = smov (!%p215_p9), 48  }
  0x13   : > { %1226 = vmatpush3.bf16.msra.mxu0 (!%p215_p9), %v1371_v2  ;;  %v258_v9 = vrot.slane (!%p215_p9), %v1600_v8, %v257_v7  ;;  %s1481_s16 = smov (!%p215_p9), 8  }
  0x14   : > { %1231 = vmatprep.subr.bf16.mxu0 (!%p215_p9), %v1468_v1 }
  0x15   : > { %s244_s13 = scalar_select %p243_p10, %s1541_s25, 1 }
  0x17   : > { %s1153_s14 = sshll.u32 %s244_s13, 3  ;;  %s1478_s13 = smov 64  }
  0x18   : > { %s246_s17 = scalar_lea.vmem %s1782_s0, %s1153_s14  ;;  %s1479_s14 = smov 40  }
  0x19   : > { %v1587_v3 = vld [vmem:[%s246_s17] sm:$0xff] }
  0x1a   : > { %v250_v4 = vpack.c.bf16 %v1587_v3, %v1587_v3 }
  0x1c   : > { %1228 = vmatmul.mubr.msk.bf16.vlgmr.msra.gmra.mrb[0].mxu0 %vm271_vm1, %v250_v4 }
  0x1d   : > { %1233 = vmatprep.mubr.msk.bf16.mxu0 %vm1469_vm0, %v1468_v1 }
  0xef   : > { %v309_v10 = vpop.f32.mrb[0].mxu0 }
  0xf0   : > { %v310_v11 = vadd.f32 %v309_v10, %v258_v9  ;;  %v1229_v12 = vpop.f32.mrb[1].mxu0 }
  0xf1   : > { %v312_v13 = vpop.f32.mrb[2].mxu0 }
  0xf2   : > { %v1603_v14 = vpack.c.bf16 %v310_v11, %v310_v11  ;;  %v1230_v15 = vpop.f32.mrb[3].mxu0 }
  0xf4   : > { %430 = vrot.lane.b32.xlu1 %v1603_v14, %s1470_s20  ;;  %317 = vrot.lane.b32.xlu0 %v1603_v14, %s1471_s26  ;;  %s1482_s26 = smov 16  }
  0xf8   : > { %551 = vrot.lane.b32.xlu1 %v1603_v14, %s1472_s28  ;;  %432 = vrot.lane.b32.xlu0 %v1603_v14, %s1473_s29  ;;  %s1483_s28 = smov 24  }
  0xfc   : > { %670 = vrot.lane.b32.xlu1 %v1603_v14, %s1474_s9  ;;  %549 = vrot.lane.b32.xlu0 %v1603_v14, %s1475_s10 }
 0x100   : > { %668 = vrot.lane.b32.xlu0 %v1603_v14, %s1476_s11 }
 0x166   : > { %v318_v16 = vpop.permute.xlu0 %317  ;;  %v431_v18 = vpop.permute.xlu1 %430 }
 0x167   : > { %v324_v17 = vsel %vm319_vm2, %v318_v16, 0 }
 0x168   : > { %1232 = vmatpush3.bf16.xpose.msra.mxu0 %v324_v17 }
 0x169   : > { %1237 = vmatprep.subr.bf16.mxu0 %v1468_v1 }
 0x16a   : > { %v433_v19 = vpop.permute.xlu0 %432  ;;  %v552_v21 = vpop.permute.xlu1 %551 }
 0x16b   : > { %v438_v20 = vsel %vm319_vm2, %v433_v19, 0  ;;  %v557_v22 = vsel %vm319_vm2, %v552_v21, 0 }
 0x16c   : > { %1244 = vmatpush3.bf16.xpose.msra.mxu1 %v438_v20 }
 0x16d   : > { %1255 = vmatprep.subr.bf16.mxu1 %v1468_v1 }
 0x16e   : > { %v671_v23 = vpop.permute.xlu1 %670  ;;  %v550_v24 = vpop.permute.xlu0 %549 }
 0x16f   : > { %1234 = vmatmul.mubr.msk.bf16.vlgmr.msra.gmra.mrb[4].mxu0 %vm319_vm2, %v1603_v14  ;;  %v676_v25 = vsel %vm319_vm2, %v671_v23, 0 }
 0x170   : > { %1239 = vmatprep.mubr.msk.bf16.mxu0 %vm1469_vm0, %v1468_v1 }
 0x172   : > { %v669_v26 = vpop.permute.xlu0 %668 }
 0x173   : > { %1246 = vmatmul.mubr.msk.bf16.vlgmr.msra.gmra.mrb[0].mxu1 %vm319_vm2, %v431_v18 }
 0x174   : > { %1256 = vmatpush3.bf16.xpose.msra.mxu1 %v557_v22  ;;  %1257 = vmatprep.mubr.msk.bf16.mxu1 %vm1469_vm0, %v1468_v1 }
 0x175   : > { %1267 = vmatprep.subr.bf16.mxu1 %v1468_v1 }
 0x17b   : > { %1258 = vmatmul.mubr.msk.bf16.vlgmr.msra.gmra.mrb[4].mxu1 %vm319_vm2, %v550_v24 }
 0x17c   : > { %1268 = vmatpush3.bf16.xpose.msra.mxu1 %v676_v25  ;;  %1269 = vmatprep.mubr.msk.bf16.mxu1 %vm1469_vm0, %v1468_v1 }
 0x17d   : > { %1279 = vmatprep.subr.bf16.mxu1 %v1468_v1 }
 0x183   : > { %1270 = vmatmul.mubr.msk.bf16.vlgmr.msra.gmra.mrb[8].mxu1 %vm319_vm2, %v669_v26 }
 0x184   : > { %1283 = vmatprep.mubr.msk.bf16.mxu1 %vm1469_vm0, %v1468_v1 }
 0x242   : > { %v360_v27 = vpop.f32.mrb[4].mxu0 }
 0x243   : > { %v1235_v28 = vpop.f32.mrb[5].mxu0  ;;  %v366_v29 = vsel %vm319_vm2, %v360_v27, -inf }
 0x244   : > { %367 = vmax.xlane.f32.xlu1 %v366_v29  ;;  %v363_v30 = vpop.f32.mrb[6].mxu0 }
 0x245   : > { %v1236_v31 = vpop.f32.mrb[7].mxu0 }
 0x246   : > { %v474_v32 = vpop.f32.mrb[0].mxu1 }
 0x247   : > { %v1247_v33 = vpop.f32.mrb[1].mxu1  ;;  %v480_v34 = vsel %vm319_vm2, %v474_v32, -inf }
 0x248   : > { %481 = vmax.xlane.f32.xlu0 %v480_v34  ;;  %v477_v35 = vpop.f32.mrb[2].mxu1 }
 0x249   : > { %v1248_v36 = vpop.f32.mrb[3].mxu1 }
 0x24e   : > { %v593_v37 = vpop.f32.mrb[4].mxu1 }
 0x24f   : > { %v1259_v38 = vpop.f32.mrb[5].mxu1  ;;  %v599_v39 = vsel %vm319_vm2, %v593_v37, -inf }
 0x250   : > { %600 = vmax.xlane.f32.xlu0 %v599_v39  ;;  %v596_v40 = vpop.f32.mrb[6].mxu1 }
 0x251   : > { %v1260_v41 = vpop.f32.mrb[7].mxu1 }
 0x252   : > { %v1372_v41 = vld [vmem:[%s1784_s2] sm:$0xff]  }
 0x253   : > { %1280 = vmatpush3.bf16.msra.mxu1 %v1372_v41  ;;  %v960_v41 = vsub.s32 3, %v1594_v6 }
 0x254   : > { %1281 = vmatprep.subr.bf16.mxu1 %v1468_v1 }
 0x256   : > { %v712_v42 = vpop.f32.mrb[8].mxu1 }
 0x257   : > { %v1271_v43 = vpop.f32.mrb[9].mxu1  ;;  %v718_v44 = vsel %vm319_vm2, %v712_v42, -inf }
 0x258   : > { %v715_v45 = vpop.f32.mrb[10].mxu1  ;;  %719 = vmax.xlane.f32.xlu1 %v718_v44 }
 0x259   : > { %v1272_v46 = vpop.f32.mrb[11].mxu1 }
 0x2d1   : > { %v368_v47 = vpop.xlane.xlu1 %367 }
 0x2d2   : > { %v369_v48 = vsub.f32 %v360_v27, %v368_v47 }
 0x2d4   : > { %v370_v49 = vmul.f32 1.442695, %v369_v48 }
 0x2d5   : > { %v482_v50 = vpop.xlane.xlu0 %481 }
 0x2d6   : > { %1384 = vpow2.f32 %v370_v49  ;;  %v483_v51 = vsub.f32 %v474_v32, %v482_v50 }
 0x2d8   : > { %v484_v52 = vmul.f32 1.442695, %v483_v51 }
 0x2da   : > { %1386 = vpow2.f32 %v484_v52 }
 0x2dd   : > { %v601_v53 = vpop.xlane.xlu0 %600 }
 0x2de   : > { %v602_v54 = vsub.f32 %v593_v37, %v601_v53 }
 0x2e0   : > { %v1385_v55 = vpop.eup %1384  ;;  %v603_v56 = vmul.f32 1.442695, %v602_v54 }
 0x2e1   : > { %v372_v57 = vsel %vm319_vm2, %v1385_v55, 0.0 }
 0x2e2   : > { %1388 = vpow2.f32 %v603_v56  ;;  %373 = vadd.xlane.f32.xlu0 %v372_v57  ;;  %v794_v57 = vsub.s32 1, %v1594_v6 }
 0x2e4   : > { %v1387_v58 = vpop.eup %1386 }
 0x2e5   : > { %v486_v59 = vsel %vm319_vm2, %v1387_v58, 0.0  ;;  %v720_v62 = vpop.xlane.xlu1 %719 }
 0x2e6   : > { %487 = vadd.xlane.f32.xlu1 %v486_v59  ;;  %v721_v63 = vsub.f32 %v712_v42, %v720_v62  ;;  %v1373_v42 = vld [vmem:[%s1784_s2 + $0x8] sm:$0xff]  }
 0x2e7   : > { %1282 = vmatpush3.bf16.msra.mxu1 %v1373_v42 }
 0x2e8   : > { %v722_v0 = vmul.f32 1.442695, %v721_v63  ;;  %1295 = vmatprep.subr.bf16.mxu1 %v1468_v1 }
 0x2ea   : > { %1390 = vpow2.f32 %v722_v0 }
 0x2ec   : > { %v1389_v60 = vpop.eup %1388 }
 0x2ed   : > { %v605_v61 = vsel %vm319_vm2, %v1389_v60, 0.0 }
 0x2ee   : > { %606 = vadd.xlane.f32.xlu0 %v605_v61 }
 0x2f4   : > { %v1391_v2 = vpop.eup %1390 }
 0x2f5   : > { %v724_v4 = vsel %vm319_vm2, %v1391_v2, 0.0 }
 0x2f7   : > { %492 = vrot.lane.b32.xlu1 %v1603_v14, %s1477_s12 }
 0x304   : > { %378 = vrot.lane.b32.xlu0 %v1603_v14, %s1478_s13  ;;  %s240_s13 = sand.u32 1, %s1458_s22  }
 0x308   : > { %730 = vrot.lane.b32.xlu0 %v1603_v14, %s1479_s14  ;;  %s1152_s14 = sshll.u32 %s240_s13, 3 }
 0x31b   : > { %725 = vadd.xlane.f32.xlu1 %v724_v4 }
 0x32c   : > { %611 = vrot.lane.b32.xlu1 %v1603_v14, %s1480_s15  ;;  %s1183_s15 = sshll.u32 %s1541_s25, 7  ;;  %s1484_s25 = smov [#allocation3]  }
 0x32d   : > { %s1739_s20 = scalar_lea.hbm %s1788_s6, %s1183_s15  ;;  %s1408_s29 = sshll.u32 %s1484_s25, 4  ;;  %s1409_s29 = int_to_ptr.vmem [resolvable:$false] %s1408_s29 }
 0x32e   : > { %s1410_s9 = scalar_lea.vmem %s1409_s29, 256 }
 0x36f   : > { %v374_v5 = vpop.xlane.xlu0 %373 }
 0x370   : > { %1392 = vrcp.f32 %v374_v5 }
 0x373   : > { %v488_v7 = vpop.xlane.xlu1 %487 }
 0x374   : > { %1394 = vrcp.f32 %v488_v7 }
 0x377   : > { %v493_v15 = vpop.permute.xlu1 %492 }
 0x378   : > { %v498_v18 = vsel %vm383_vm3, %v493_v15, 0  ;;  %v1378_v15 = vld [vmem:[%s1786_s4 + $0x10] sm:$0xff]  }
 0x37a   : > { %v1393_v9 = vpop.eup %1392 }
 0x37b   : > { %v607_v10 = vpop.xlane.xlu0 %606  ;;  %v376_v11 = vmul.f32 %v1393_v9, %v1385_v55 }
 0x37c   : > { %1396 = vrcp.f32 %v607_v10 }
 0x37d   : > { %v377_v16 = vpack.c.bf16 %v376_v11, %v376_v11  ;;  %v1374_v11 = vld [vmem:[%s1785_s3] sm:$0xff]  }
 0x37e   : > { %v1395_v17 = vpop.eup %1394 }
 0x37f   : > { %v379_v12 = vpop.permute.xlu0 %378  ;;  %v490_v14 = vmul.f32 %v1395_v17, %v1387_v58  ;;  %v795_v58 = vrot.slane %v1600_v8, %v794_v57  ;;  %v1380_v17 = vld [vmem:[%s1786_s4 + $0x20] sm:$0xff]   ;;  %v1066_v57 = vsub.s32 6, %v1594_v6 }
 0x380   : > { %v385_v13 = vsel %vm383_vm3, %v379_v12, 0  ;;  %v1376_v12 = vld [vmem:[%s1786_s4] sm:$0xff]  }
 0x381   : > { %1238 = vmatpush3.bf16.msra.mxu0 %v385_v13  ;;  %v491_v19 = vpack.c.bf16 %v490_v14, %v490_v14  ;;  %v1377_v13 = vld [vmem:[%s1786_s4 + $0x8] sm:$0xff]  }
 0x382   : > { %1249 = vmatprep.subr.bf16.mxu0 %v1468_v1 }
 0x383   : > { %v731_v25 = vpop.permute.xlu0 %730 }
 0x384   : > { %1240 = vmatmul.mubr.msk.bf16.vlgmr.msra.gmra.mrb[8].mxu0 %vm319_vm2, %v377_v16  ;;  %v736_v27 = vsel %vm383_vm3, %v731_v25, 0  ;;  %v1379_v16 = vld [vmem:[%s1786_s4 + $0x18] sm:$0xff]  }
 0x385   : > { %1250 = vmatpush3.bf16.msra.mxu0 %v498_v18  ;;  %1251 = vmatprep.mubr.msk.bf16.mxu0 %vm1469_vm0, %v1468_v1  ;;  %v1381_v18 = vld [vmem:[%s1786_s4 + $0x28] sm:$0xff]  }
 0x386   : > { %1261 = vmatprep.subr.bf16.mxu0 %v1468_v1  ;;  %v1397_v20 = vpop.eup %1396 }
 0x387   : > { %v609_v22 = vmul.f32 %v1397_v20, %v1389_v60 }
 0x389   : > { %v610_v26 = vpack.c.bf16 %v609_v22, %v609_v22  ;;  %v873_v22 = vsub.s32 5, %v1594_v6 }
 0x38c   : > { %1252 = vmatmul.mubr.msk.bf16.vlgmr.msra.gmra.mrb[12].mxu0 %vm319_vm2, %v491_v19 }
 0x38d   : > { %1263 = vmatprep.mubr.msk.bf16.mxu0 %vm1469_vm0, %v1468_v1 }
 0x3a8   : > { %v726_v21 = vpop.xlane.xlu1 %725 }
 0x3a9   : > { %1398 = vrcp.f32 %v726_v21  ;;  %v868_v21 = vsub.s32 4, %v1594_v6 }
 0x3ac   : > { %v612_v23 = vpop.permute.xlu1 %611 }
 0x3ad   : > { %v617_v24 = vsel %vm383_vm3, %v612_v23, 0  ;;  %v869_v23 = vrot.slane %v1600_v8, %v868_v21 }
 0x3ae   : > { %1262 = vmatpush3.bf16.msra.mxu0 %v617_v24 }
 0x3af   : > { %1273 = vmatprep.subr.bf16.mxu0 %v1468_v1 }
 0x3b1   : > { %1264 = vmatmul.mubr.msk.bf16.vlgmr.msra.gmra.mrb[16].mxu0 %vm319_vm2, %v610_v26  ;;  %v874_v26 = vrot.slane %v1600_v8, %v873_v22 }
 0x3b2   : > { %1274 = vmatpush3.bf16.msra.mxu0 %v736_v27  ;;  %1275 = vmatprep.mubr.msk.bf16.mxu0 %vm1469_vm0, %v1468_v1 }
 0x3b3   : > { %v1399_v28 = vpop.eup %1398  ;;  %1287 = vmatprep.subr.bf16.mxu0 %v1468_v1 }
 0x3b4   : > { %v728_v29 = vmul.f32 %v1399_v28, %v1391_v2 }
 0x3b6   : > { %v729_v30 = vpack.c.bf16 %v728_v29, %v728_v29 }
 0x3b9   : > { %1276 = vmatmul.mubr.msk.bf16.vlgmr.msra.gmra.mrb[20].mxu0 %vm319_vm2, %v729_v30  ;;  %v1382_v30 = vld [vmem:[%s1786_s4 + $0x30] sm:$0xff]  }
 0x3ba   : > { %1291 = vmatprep.mubr.msk.bf16.mxu0 %vm1469_vm0, %v1468_v1  ;;  %1288 = vmatpush3.bf16.msra.mxu0 %v1374_v11 }
 0x3bb   : > { %1289 = vmatprep.subr.bf16.mxu0 %v1468_v1 }
 0x457   : > { %v421_v31 = vpop.f32.mrb[8].mxu0 }
 0x458   : > { %v427_v32 = vpack.c.bf16 %v421_v31, %v421_v31  ;;  %v1241_v33 = vpop.f32.mrb[9].mxu0  ;;  %v1383_v31 = vld [vmem:[%s1786_s4 + $0x38] sm:$0xff]  }
 0x459   : > { %v424_v34 = vpop.f32.mrb[10].mxu0 }
 0x45a   : > { %429 = vst.msk [vmem:[#allocation2] sm:$0xf] %vm428_vm4, %v427_v32  ;;  %v1242_v35 = vpop.f32.mrb[11].mxu0  ;;  %v883_v32 = vsub.s32 2, %v1594_v6 }
 0x45c   : > { %v884_v33 = vrot.slane %v1600_v8, %v883_v32 }
 0x45f   : > { %v534_v36 = vpop.f32.mrb[12].mxu0 }
 0x460   : > { %v1186_v37 = vpack.c.bf16 %v534_v36, %v534_v36  ;;  %v1253_v38 = vpop.f32.mrb[13].mxu0 }
 0x461   : > { %v537_v39 = vpop.f32.mrb[14].mxu0 }
 0x462   : > { %544 = vrot.lane.b32.xlu1 %v1186_v37, %s1481_s16  ;;  %v1254_v40 = vpop.f32.mrb[15].mxu0  ;;  %s242_s16 = scalar_lea.vmem [#allocation3], %s1152_s14 }
 0x463   : > { %s1089_s17 = sshll.u32 %s242_s16, 4  ;;  %s1741_s17 = int_to_ptr.vmem [resolvable:$true] %s1089_s17 }
 0x464   : > { %p1411_p0 = scmp.lt.s32.totalorder %s1741_s17, %s1409_s29 }
 0x484   : > { %v653_v43 = vpop.f32.mrb[16].mxu0 }
 0x485   : > { %v1187_v44 = vpack.c.bf16 %v653_v43, %v653_v43  ;;  %v1265_v45 = vpop.f32.mrb[17].mxu0 }
 0x486   : > { %v656_v46 = vpop.f32.mrb[18].mxu0 }
 0x487   : > { %663 = vrot.lane.b32.xlu0 %v1187_v44, %s1482_s26  ;;  %v1266_v47 = vpop.f32.mrb[19].mxu0  ;;  %s1076_s26 = scalar_lea.sflag [#allocation4], %s240_s13 }
 0x48c   : > { %v772_v48 = vpop.f32.mrb[20].mxu0 }
 0x48d   : > { %v1188_v49 = vpack.c.bf16 %v772_v48, %v772_v48  ;;  %v1277_v50 = vpop.f32.mrb[21].mxu0 }
 0x48e   : > { %v775_v51 = vpop.f32.mrb[22].mxu0 }
 0x48f   : > { %782 = vrot.lane.b32.xlu1 %v1188_v49, %s1483_s28  ;;  %v1278_v52 = vpop.f32.mrb[23].mxu0  ;;  %s1404_s28 = scalar_lea.vmem %s1741_s17, 128 }
 0x490   : > { %p1405_p11 = scmp.ne.s32.totalorder %s1741_s17, %s1404_s28  ;;  %p1412_p1 = scmp.lt.s32.totalorder %s1410_s9, %s1404_s28 }
 0x492   : > { %p1406_p12 = pnand %p1405_p11, %p1558_p5  ;;  %p1413_p2 = por %p1412_p1, %p1411_p0 }
 0x494   : > { %p1407_p13 = pneg %p1406_p12 }
 0x496   : > { %p1414_p3 = pnand %p1413_p2, %p1407_p13 }
 0x4d4   : > { %v545_v53 = vpop.permute.xlu1 %544 }
 0x4d5   : > { %548 = vst.msk [vmem:[#allocation2] sm:$0xf] %vm547_vm5, %v545_v53 }
 0x4f9   : > { %v664_v54 = vpop.permute.xlu0 %663 }
 0x4fa   : > { %667 = vst.msk [vmem:[#allocation2] sm:$0xf] %vm666_vm6, %v664_v54 }
 0x501   : > { %v783_v55 = vpop.permute.xlu1 %782 }
 0x502   : > { %786 = vst.msk [vmem:[#allocation2] sm:$0xf] %vm785_vm7, %v783_v55 }
 0x509   : > { %v787_v56 = vld [vmem:[#allocation2] sm:$0xf] }
 0x50a   : > { %1284 = vmatmul.mubr.msk.bf16.vlgmr.msra.gmra.mrb[12].mxu1 %vm271_vm1, %v787_v56 }
 0x50b   : > { %1311 = vmatprep.mubr.msk.bf16.mxu1 %vm1469_vm0, %v1468_v1  ;;  %1296 = vmatpush3.bf16.msra.mxu1 %v1376_v12 }
 0x50c   : > { %1297 = vmatprep.subr.bf16.mxu1 %v1468_v1 }
 0x50f   : > { %1298 = vmatpush3.bf16.msra.mxu1 %v1377_v13 }
 0x510   : > { %1299 = vmatprep.subr.bf16.mxu1 %v1468_v1 }
 0x513   : > { %1300 = vmatpush3.bf16.msra.mxu1 %v1378_v15 }
 0x514   : > { %1301 = vmatprep.subr.bf16.mxu1 %v1468_v1 }
 0x517   : > { %1302 = vmatpush3.bf16.msra.mxu1 %v1379_v16 }
 0x518   : > { %1303 = vmatprep.subr.bf16.mxu1 %v1468_v1 }
 0x51b   : > { %1304 = vmatpush3.bf16.msra.mxu1 %v1380_v17 }
 0x51c   : > { %1305 = vmatprep.subr.bf16.mxu1 %v1468_v1 }
 0x51f   : > { %1306 = vmatpush3.bf16.msra.mxu1 %v1381_v18 }
 0x520   : > { %1307 = vmatprep.subr.bf16.mxu1 %v1468_v1 }
 0x523   : > { %1308 = vmatpush3.bf16.msra.mxu1 %v1382_v30 }
 0x524   : > { %1309 = vmatprep.subr.bf16.mxu1 %v1468_v1  ;;  %v961_v1 = vrot.slane %v1600_v8, %v960_v41 }
 0x527   : > { %1310 = vmatpush3.bf16.msra.mxu1 %v1383_v31 }
 0x5dd   : > { %v845_v59 = vpop.f32.mrb[12].mxu1 }
 0x5de   : > { %v846_v60 = vadd.f32 %v845_v59, %v795_v58  ;;  %v1285_v61 = vpop.f32.mrb[13].mxu1  ;;  %v1071_v58 = vsub.s32 7, %v1594_v6  ;;  %v1067_v59 = vrot.slane %v1600_v8, %v1066_v57 }
 0x5df   : > { %v848_v62 = vpop.f32.mrb[14].mxu1 }
 0x5e0   : > { %v1286_v63 = vpop.f32.mrb[15].mxu1  ;;  %v851_v0 = vadd.f32 %v846_v60, %v1587_v3  ;;  %v1375_v3 = vld [vmem:[%s1785_s3 + $0x8] sm:$0xff]   ;;  %v1072_v62 = vrot.slane %v1600_v8, %v1071_v58 }
 0x5e1   : > { %1290 = vmatpush3.bf16.msra.mxu0 %v1375_v3 }
 0x5e2   : > { %v852_v2 = vsel %vm271_vm1, %v851_v0, 0.0 }
 0x5e3   : > { %853 = vadd.xlane.f32.xlu0 %v852_v2 }
 0x670   : > { %v854_v4 = vpop.xlane.xlu0 %853 }
 0x671   : > { %v856_v5 = vmul.f32 0.03125, %v854_v4 }
 0x673   : > { %v857_v7 = vsub.f32 %v851_v0, %v856_v5 }
 0x675   : > { %v858_v9 = vmul.f32 %v857_v7, %v857_v7 }
 0x677   : > { %v859_v10 = vsel %vm271_vm1, %v858_v9, 0.0 }
 0x678   : > { %860 = vadd.xlane.f32.xlu1 %v859_v10 }
 0x705   : > { %v861_v14 = vpop.xlane.xlu1 %860 }
 0x706   : > { %v862_v19 = vmul.f32 0.03125, %v861_v14 }
 0x708   : > { %v863_v20 = vadd.f32 1e-05, %v862_v19 }
 0x70a   : > { %1400 = vrsqrt.f32 %v863_v20 }
 0x714   : > { %v1401_v24 = vpop.eup %1400 }
 0x715   : > { %v865_v25 = vmul.f32 %v1401_v24, %v857_v7 }
 0x717   : > { %v870_v27 = vmul.f32 %v869_v23, %v865_v25 }
 0x719   : > { %v875_v28 = vadd.f32 %v874_v26, %v870_v27 }
 0x71b   : > { %v876_v29 = vpack.c.bf16 %v875_v28, %v875_v28 }
 0x71d   : > { %1292 = vmatmul.mubr.msk.bf16.vlgmr.msra.gmra.mrb[24].mxu0 %vm271_vm1, %v876_v29 }
 0x7f0   : > { %v934_v34 = vpop.f32.mrb[24].mxu0 }
 0x7f1   : > { %v935_v35 = vadd.f32 %v934_v34, %v884_v33  ;;  %v1293_v36 = vpop.f32.mrb[25].mxu0 }
 0x7f2   : > { %v937_v37 = vpop.f32.mrb[26].mxu0 }
 0x7f3   : > { %v940_v38 = vmax.f32 %v935_v35, 0.0  ;;  %v1294_v39 = vpop.f32.mrb[27].mxu0 }
 0x7f5   : > { %v941_v40 = vpack.c.bf16 %v940_v38, %v940_v38 }
 0x7f7   : > { %1312 = vmatmul.mubr.bf16.vlgmr.msra.gmra.mrb[16].mxu1 %v941_v40 }
 0x8ca   : > { %v1044_v42 = vpop.f32.mrb[16].mxu1 }
 0x8cb   : > { %v1045_v43 = vadd.f32 %v1044_v42, %v961_v1  ;;  %v1313_v44 = vpop.f32.mrb[17].mxu1 }
 0x8cc   : > { %v1047_v45 = vpop.f32.mrb[18].mxu1 }
 0x8cd   : > { %v1314_v46 = vpop.f32.mrb[19].mxu1  ;;  %v1050_v47 = vadd.f32 %v1045_v43, %v875_v28 }
 0x8cf   : > { %v1051_v48 = vsel %vm271_vm1, %v1050_v47, 0.0 }
 0x8d0   : > { %1052 = vadd.xlane.f32.xlu0 %v1051_v48 }
 0x95d   : > { %v1053_v49 = vpop.xlane.xlu0 %1052 }
 0x95e   : > { %v1054_v50 = vmul.f32 0.03125, %v1053_v49 }
 0x960   : > { %v1055_v51 = vsub.f32 %v1050_v47, %v1054_v50 }
 0x962   : > { %v1056_v52 = vmul.f32 %v1055_v51, %v1055_v51 }
 0x964   : > { %v1057_v53 = vsel %vm271_vm1, %v1056_v52, 0.0 }
 0x965   : > { %1058 = vadd.xlane.f32.xlu0 %v1057_v53 }
 0x9f2   : > { %v1059_v54 = vpop.xlane.xlu0 %1058 }
 0x9f3   : > { %v1060_v55 = vmul.f32 0.03125, %v1059_v54 }
 0x9f5   : > { %v1061_v56 = vadd.f32 1e-05, %v1060_v55 }
 0x9f7   : > { %1402 = vrsqrt.f32 %v1061_v56 }
 0xa01   : > { %v1403_v60 = vpop.eup %1402 }
 0xa02   : > { %v1063_v61 = vmul.f32 %v1403_v60, %v1055_v51 }
 0xa04   : > { %v1068_v63 = vmul.f32 %v1067_v59, %v1063_v61 }
 0xa06   : > { %v1073_v0 = vadd.f32 %v1072_v62, %v1068_v63 }
 0xa08   : > { %1074 = vst.msk [vmem:[%s242_s16] sm:$0xff] %vm271_vm1, %v1073_v0 }
 0xa09   : > { %1417 = shalt.err (!%p1414_p3)
}
 0xa0a   : > { %s1418_s10 = scalar_lea.hbm %s1739_s20, 128  ;;  %s1422_s13 = scalar_lea.hbm %s1788_s6, 256 }
 0xa0b   : > { %p1419_p4 = scmp.ne.s32.totalorder %s1739_s20, %s1418_s10  ;;  %p1423_p9 = scmp.lt.u32.totalorder %s1739_s20, %s1788_s6 }
 0xa0c   : > { %p1424_p10 = scmp.lt.u32.totalorder %s1422_s13, %s1418_s10  ;;  %p1426_p12 = scmp.lt.u32.totalorder %s1418_s10, %s1739_s20 }
 0xa0d   : > { %p1420_p7 = pnand %p1419_p4, %p1558_p5 }
 0xa0e   : > { %p1425_p11 = por %p1424_p10, %p1423_p9 }
 0xa0f   : > { %p1421_p8 = pneg %p1420_p7 }
 0xa10   : > { %p1427_p13 = por %p1426_p12, %p1425_p11 }
 0xa12   : > { %p1428_p0 = pnand %p1427_p13, %p1421_p8 }
 0xa14   : > { %1431 = shalt.err (!%p1428_p0)
}
 0xa15   : > { %1315 = dma.vmem_to_hbm [thread:$0]  (%p1558_p5), %s1741_s17, 128, %s1739_s20, %s1076_s26  }
 0xa16 PF: > { %p1321_p1 = scmp.ge.s32.totalorder %s1466_s24, 2  ;;  %s1101_s16 = sand.u32 1, %s1454_s21  }
 0xa17   : > { %s1102_s18 = scalar_lea.sflag [#allocation4], %s1101_s16 }
 0xa18   : > { %p1318_p2 = pnand %p1321_p1, %p1562_p6 }
 0xa1a   : > { %1449 = dma.done.wait (!%p1318_p2), %s1102_s18, 128  }
 0xa1b   : > { %1451 = vsyncadd (!%p1318_p2), %s1102_s18, 4294967168  ;;  %p16_p3 = scmp.ge.s32.totalorder %s1545_s27, 4   ;;  %s1791_s21 = smov %s1458_s22 }
 0xa1c   : > { %s1792_s22 = smov %s1462_s23  ;;  %s1793_s23 = smov %s1556_s30 }
 0xa1d   : > { %s1794_s24 = smov %s1545_s27  ;;  %18 = sbr.rel (!%p16_p3) target bundleno = 3 (0x3), region = 79 }
 0xa24   :  { %1107 = vsyncpa [#allocation4], 1 }
 0xa25   :  { %1109 = vsyncpa [#allocation4 + $0x1], 1 }

</bundles_post_ra>
